<compile_context>
chip_gen: v5e
topology: v5e:2x2
jax: 0.10.0
libtpu: 0.0.40
codegen_flags: <defaults>
</compile_context>

<pallas_src>
import functools

import jax
import jax.numpy as jnp
from jax import lax
from jax.experimental import pallas as pl
from jax.experimental.pallas import tpu as pltpu


def _alignment_loss_kernel(graph_ref, sem_ref, out_ref, zall_ref, *,
                           temperature, batch, block_b):
    b = pl.program_id(0)
    nb = pl.num_programs(0)
    B = batch
    inv_t = jnp.float32(1.0 / temperature)

    # ---- streaming phase: mean-pool this tile of graphs over the node axis and park the
    # pooled rows in the first half of the resident (2B, D) scratch. ----
    g = graph_ref[...].astype(jnp.float32)                        # (Bt, L, D)
    pooled_tile = jnp.mean(g, axis=1)                             # (Bt, D)
    start = pl.multiple_of(b * block_b, block_b)
    zall_ref[pl.ds(start, block_b), :] = pooled_tile

    # ---- final phase (last grid step): contrastive loss over the 2B anchors. ----
    @pl.when(b == nb - 1)
    def _():
        # Second half of the "all states" buffer = semantic states (no concatenate copy).
        zall_ref[pl.ds(B, B), :] = sem_ref[...].astype(jnp.float32)

        x = zall_ref[...]                                          # (N, D), N = 2B
        # L2-normalize with rsqrt (EUP slot) + multiply instead of sqrt + divide.
        z = x * lax.rsqrt(jnp.sum(x * x, axis=-1, keepdims=True) + jnp.float32(1e-24))

        # Similarity on the MXU; 1/temperature folded into the left operand (O(N*D) scale
        # instead of an O(N^2) divide over the similarity matrix).
        # TODO(synk): at production N, D (>=128) cast the operands to bfloat16 here
        # (keep preferred_element_type=f32) for the full-rate MXU path on v5e/v6e/v7x.
        s = jnp.dot(z * inv_t, z.T, preferred_element_type=jnp.float32)   # (N, N)

        # diag(s) == inv_t and every entry <= inv_t, so inv_t is a valid stabilizer and the
        # self term is removed analytically by subtracting exactly 1.0 — no iota/mask/masked-max.
        e = jnp.exp(s - inv_t)                                     # all entries <= 1
        denom = inv_t + jnp.log(
            jnp.maximum(jnp.sum(e, axis=1, keepdims=True) - 1.0, jnp.float32(1e-30)))  # (N, 1)

        # Positive similarity of anchor i is <z_pooled[i], z_sem[i]>/T, identical for both
        # halves -> one paired O(B*D) dot instead of an (N, N) mask + cross-lane reduce.
        zp = z[:B, :]
        zs = z[B:, :]
        pos = inv_t * jnp.sum(zp * zs, axis=-1, keepdims=True)     # (B, 1)

        # mean over the N = 2B anchors of (denom_i - pos_i); pos is shared by both halves.
        out_ref[0, 0] = (jnp.sum(denom) - 2.0 * jnp.sum(pos)) / jnp.float32(2 * B)


def alignment_loss(graph_states, semantic_states, temperature=0.5, block_b=None):
    """graph_states: (B, L, D); semantic_states: (B, D). Returns scalar f32 loss."""
    B, L, D = graph_states.shape
    assert semantic_states.shape == (B, D)

    if block_b is None:
        # Target ~1 MiB per streamed graph tile so the pooling-phase DMA stays pipelined.
        per_graph = L * D * jnp.dtype(graph_states.dtype).itemsize
        block_b = max(1, min(B, (1 << 20) // max(per_graph, 1)))
    # Make the tile evenly divide B so every grid step writes a full tile of pooled rows.
    while B % block_b:
        block_b -= 1
    nb = B // block_b

    kernel = functools.partial(_alignment_loss_kernel,
                               temperature=float(temperature), batch=B, block_b=block_b)

    out = pl.pallas_call(
        kernel,
        out_shape=jax.ShapeDtypeStruct((1, 1), jnp.float32),
        grid=(nb,),
        in_specs=[
            # Streamed: one tile of graphs per grid step (double-buffered by Pallas).
            pl.BlockSpec((block_b, L, D), lambda b: (b, 0, 0)),
            # Small; constant block index -> fetched once and kept resident.
            pl.BlockSpec((B, D), lambda b: (0, 0)),
        ],
        # Scalar loss lives in SMEM: no padded 8x128 VMEM tile / masked partial store.
        out_specs=pl.BlockSpec(memory_space=pltpu.MemorySpace.SMEM),
        # Resident "all states" buffer: pooled rows accumulate here across grid steps and the
        # semantic rows are appended on the last step (doubles as the concat buffer).
        scratch_shapes=[pltpu.VMEM((2 * B, D), jnp.float32)],
        compiler_params=pltpu.CompilerParams(
            # Pooled rows accumulate in a resident scratch and the loss is formed on the last
            # step, so the batch axis must stay sequential.
            # TODO(synk): for v7x's 2 TCs, split pooling into its own pallas_call with a
            # "parallel" batch axis to stream half the batch per core.
            dimension_semantics=("arbitrary",),
        ),
    )(graph_states, semantic_states)
    return out[0, 0]


def _reference_loss(graph_states, semantic_states, temperature=0.5):
    # Pure-JAX reference of the same SupConLoss math, for verification.
    B = graph_states.shape[0]
    pooled = jnp.mean(graph_states.astype(jnp.float32), axis=1)
    x = jnp.concatenate([pooled, semantic_states.astype(jnp.float32)], axis=0)
    z = x / jnp.maximum(jnp.linalg.norm(x, axis=-1, keepdims=True), 1e-12)
    s = (z @ z.T) / temperature
    N = 2 * B
    eye = jnp.eye(N, dtype=bool)
    s_kept = jnp.where(eye, -jnp.inf, s)
    denom = jax.scipy.special.logsumexp(s_kept, axis=1)
    pos_idx = jnp.concatenate([jnp.arange(B) + B, jnp.arange(B)])
    pos_sim = s[jnp.arange(N), pos_idx]
    return jnp.mean(-(pos_sim - denom))


if __name__ == "__main__":
    key = jax.random.PRNGKey(0)
    B, L, D = 4, 6, 32   # 4 graphs, 6 nodes each, hidden dim 32
    k1, k2 = jax.random.split(key)
    graph_states = jax.random.normal(k1, (B, L, D), dtype=jnp.float32)
    semantic_states = jax.random.normal(k2, (B, D), dtype=jnp.float32)

    # block_b=2 exercises the gridded/pipelined pooling path even at this tiny demo size.
    loss = alignment_loss(graph_states, semantic_states, temperature=0.5, block_b=2)
    loss = jax.block_until_ready(loss)

    ref = _reference_loss(graph_states, semantic_states, temperature=0.5)
    assert jnp.allclose(loss, ref, atol=1e-4, rtol=1e-4), (loss, ref)

    print("KERNEL_OK")
</pallas_src>

<mosaic_0001>
module attributes {stable_mosaic.version = 11 : i64} {
  func.func @_alignment_loss_kernel(%arg0: i32, %arg1: memref<2x6x32xf32, #tpu.memory_space<vmem>>, %arg2: memref<4x32xf32, #tpu.memory_space<vmem>>, %arg3: memref<1x1xf32, #tpu.memory_space<smem>>, %arg4: memref<8x32xf32, #tpu.memory_space<vmem>>) attributes {dimension_semantics = [#tpu.dimension_semantics<arbitrary>], iteration_bounds = array<i64: 2>, scalar_prefetch = 0 : i64, scratch_operands = 1 : i64, tpu.core_type = #tpu.core_type<tc>, window_params = [{transform_indices = @transform_0, window_bounds = array<i64: 2, 6, 32>}, {pipeline_mode = #tpu.pipeline_mode<synchronous>, transform_indices = @transform_1, window_bounds = array<i64: 4, 32>}, {transform_indices = @transform_2, window_bounds = array<i64: 1, 1>}]} {
    %c0 = arith.constant 0 : index
    %c0_0 = arith.constant 0 : index
    %c0_1 = arith.constant 0 : index
    %0 = vector.load %arg1[%c0, %c0_0, %c0_1] : memref<2x6x32xf32, #tpu.memory_space<vmem>>, vector<2x6x32xf32>
    %cst = arith.constant dense<0.000000e+00> : vector<2x32xf32>
    %1 = vector.multi_reduction <add>, %0, %cst [1] : vector<2x6x32xf32> to vector<2x32xf32>
    %cst_2 = arith.constant 6.000000e+00 : f32
    %2 = vector.broadcast %cst_2 : f32 to vector<2x32xf32>
    %3 = arith.divf %1, %2 : vector<2x32xf32>
    %c2_i32 = arith.constant 2 : i32
    %4 = arith.muli %arg0, %c2_i32 : i32
    %5 = tpu.assume_multiple %4, 2 : i32
    %6 = arith.index_cast %5 : i32 to index
    %c0_3 = arith.constant 0 : index
    %7 = vector.load %arg4[%6, %c0_3] : memref<8x32xf32, #tpu.memory_space<vmem>>, vector<2x32xf32>
    tpu.vector_store %arg4[%6, %c0_3], %3 {strides = array<i32>} : memref<8x32xf32, #tpu.memory_space<vmem>>, vector<2x32xf32>,
    %c1_i32 = arith.constant 1 : i32
    %8 = arith.cmpi eq, %arg0, %c1_i32 : i32
    %9 = arith.extui %8 : i1 to i32
    %cst_4 = arith.constant 2.000000e+00 : f32
    %c0_i32 = arith.constant 0 : i32
    %10 = arith.cmpi ne, %9, %c0_i32 : i32
    scf.if %10 {
      %c0_5 = arith.constant 0 : index
      %c0_6 = arith.constant 0 : index
      %11 = vector.load %arg2[%c0_5, %c0_6] : memref<4x32xf32, #tpu.memory_space<vmem>>, vector<4x32xf32>
      %c4 = arith.constant 4 : index
      %c0_7 = arith.constant 0 : index
      %12 = vector.load %arg4[%c4, %c0_7] : memref<8x32xf32, #tpu.memory_space<vmem>>, vector<4x32xf32>
      tpu.vector_store %arg4[%c4, %c0_7], %11 {strides = array<i32>} : memref<8x32xf32, #tpu.memory_space<vmem>>, vector<4x32xf32>,
      %c0_8 = arith.constant 0 : index
      %c0_9 = arith.constant 0 : index
      %13 = vector.load %arg4[%c0_8, %c0_9] : memref<8x32xf32, #tpu.memory_space<vmem>>, vector<8x32xf32>
      %14 = arith.mulf %13, %13 : vector<8x32xf32>
      %cst_10 = arith.constant dense<0.000000e+00> : vector<8xf32>
      %15 = vector.multi_reduction <add>, %14, %cst_10 [1] : vector<8x32xf32> to vector<8xf32>
      %16 = vector.shape_cast %15 : vector<8xf32> to vector<8x1xf32>
      %cst_11 = arith.constant 1.000000e-24 : f32
      %17 = vector.broadcast %cst_11 : f32 to vector<8x1xf32>
      %18 = arith.addf %16, %17 : vector<8x1xf32>
      %19 = math.rsqrt %18 : vector<8x1xf32>
      %20 = vector.broadcast %19 : vector<8x1xf32> to vector<8x32xf32>
      %21 = arith.mulf %13, %20 : vector<8x32xf32>
      %22 = vector.broadcast %cst_4 : f32 to vector<8x32xf32>
      %23 = arith.mulf %21, %22 : vector<8x32xf32>
      %24 = tpu.transpose %21, [1, 0] : vector<8x32xf32> -> vector<32x8xf32>
      %cst_12 = arith.constant dense<0.000000e+00> : vector<8x8xf32>
      %25 = tpu.matmul %23, %24, %cst_12 {dimension_numbers = #tpu.dot_dimension_numbers<[1], [0], [0], [1], [0, 0, 1, 1], [], []>} : vector<8x32xf32>, vector<32x8xf32>, vector<8x8xf32> -> vector<8x8xf32>
      %26 = vector.broadcast %cst_4 : f32 to vector<8x8xf32>
      %27 = arith.subf %25, %26 : vector<8x8xf32>
      %28 = math.exp %27 : vector<8x8xf32>
      %cst_13 = arith.constant dense<0.000000e+00> : vector<8xf32>
      %29 = vector.multi_reduction <add>, %28, %cst_13 [1] : vector<8x8xf32> to vector<8xf32>
      %30 = vector.shape_cast %29 : vector<8xf32> to vector<8x1xf32>
      %cst_14 = arith.constant 1.000000e+00 : f32
      %31 = vector.broadcast %cst_14 : f32 to vector<8x1xf32>
      %32 = arith.subf %30, %31 : vector<8x1xf32>
      %cst_15 = arith.constant 1.000000e-30 : f32
      %33 = vector.broadcast %cst_15 : f32 to vector<8x1xf32>
      %34 = arith.maximumf %32, %33 : vector<8x1xf32>
      %35 = math.log %34 : vector<8x1xf32>
      %36 = vector.broadcast %cst_4 : f32 to vector<8x1xf32>
      %37 = arith.addf %36, %35 : vector<8x1xf32>
      %38 = vector.extract_strided_slice %21 {offsets = [0, 0], sizes = [4, 32], strides = [1, 1]} : vector<8x32xf32> to vector<4x32xf32>
      %39 = vector.extract_strided_slice %21 {offsets = [4, 0], sizes = [4, 32], strides = [1, 1]} : vector<8x32xf32> to vector<4x32xf32>
      %40 = arith.mulf %38, %39 : vector<4x32xf32>
      %cst_16 = arith.constant dense<0.000000e+00> : vector<4xf32>
      %41 = vector.multi_reduction <add>, %40, %cst_16 [1] : vector<4x32xf32> to vector<4xf32>
      %42 = vector.shape_cast %41 : vector<4xf32> to vector<4x1xf32>
      %43 = vector.broadcast %cst_4 : f32 to vector<4x1xf32>
      %44 = arith.mulf %43, %42 : vector<4x1xf32>
      %45 = vector.shape_cast %37 : vector<8x1xf32> to vector<1x8x1xf32>
      %cst_17 = arith.constant dense<0.000000e+00> : vector<1xf32>
      %46 = vector.multi_reduction <add>, %45, %cst_17 [1, 2] : vector<1x8x1xf32> to vector<1xf32>
      %47 = vector.shape_cast %46 : vector<1xf32> to vector<1x1x1xf32>
      %48 = vector.extract %47[0, 0, 0] : f32 from vector<1x1x1xf32>
      %49 = vector.shape_cast %44 : vector<4x1xf32> to vector<1x4x1xf32>
      %cst_18 = arith.constant dense<0.000000e+00> : vector<1xf32>
      %50 = vector.multi_reduction <add>, %49, %cst_18 [1, 2] : vector<1x4x1xf32> to vector<1xf32>
      %51 = vector.shape_cast %50 : vector<1xf32> to vector<1x1x1xf32>
      %52 = vector.extract %51[0, 0, 0] : f32 from vector<1x1x1xf32>
      %cst_19 = arith.constant 2.000000e+00 : f32
      %53 = arith.mulf %cst_19, %52 : f32
      %54 = arith.subf %48, %53 : f32
      %cst_20 = arith.constant 8.000000e+00 : f32
      %55 = arith.divf %54, %cst_20 : f32
      %c0_21 = arith.constant 0 : index
      %c0_22 = arith.constant 0 : index
      %56 = memref.load %arg3[%c0_21, %c0_22] : memref<1x1xf32, #tpu.memory_space<smem>>
      memref.store %55, %arg3[%c0_21, %c0_22] : memref<1x1xf32, #tpu.memory_space<smem>>
    } else {
    }
    return
  }
  func.func @transform_0(%arg0: i32) -> (i32, i32, i32) {
    %c0_i32 = arith.constant 0 : i32
    %c0_i32_0 = arith.constant 0 : i32
    %c0_i32_1 = arith.constant 0 : i32
    return %arg0, %c0_i32, %c0_i32_0 : i32, i32, i32
  }
  func.func @transform_1(%arg0: i32) -> (i32, i32) {
    %c0_i32 = arith.constant 0 : i32
    %c0_i32_0 = arith.constant 0 : i32
    %c0_i32_1 = arith.constant 0 : i32
    return %c0_i32, %c0_i32_0 : i32, i32
  }
  func.func @transform_2(%arg0: i32) -> (i32, i32) {
    %c0_i32 = arith.constant 0 : i32
    %c0_i32_0 = arith.constant 0 : i32
    %c0_i32_1 = arith.constant 0 : i32
    return %c0_i32, %c0_i32_0 : i32, i32
  }
}

</mosaic_0001>

<bundles_post_ra>
// kernel: tpu_custom_call.1
= control target key start
LH: loop header
LB: loop body
LE: loop exit
PB: predicated region body
PF: predicated region fallthrough
CT: control target
= control target key end

     0   :  { %7 = vsyncpa [#allocation4], 0  ;;  %s415_s9 = smov 0   ;;  %s450_s0 = inlined_call_operand.vmem [shape: f32[4,6,32], index: 0, kind: input, shape index: {}]   ;;  %s451_s1 = inlined_call_operand.vmem [shape: f32[4,32], index: 1, kind: input, shape index: {}]   ;;  %s452_s2 = inlined_call_operand.hbm [shape: f32[1,1], index: 2, kind: output, shape index: {}]  }
   0x1 LB: > { %s421_s10 = sadd.s32 4294967295, %s395_s9   ;;  %p325_p0 = scmp.ge.s32.totalorder %s395_s9, 1  ;;  %s395_s9 = sphi %s415_s9, %s13_s9  }
   0x2   : > { %p109_p1 = scmp.lt.s32.totalorder %s395_s9, 3 }
   0x4   : > { %p110_p2 = pnand %p325_p0, %p109_p1 }
   0x5   : > { %s426_s11 = sshll.u32 (!%p110_p2), %s421_s10, 1  ;;  %p329_p4 = scmp.ne.s32.totalorder (!%p110_p2), %s421_s10, 1 }
   0x6   : > { %113 = sbr.rel (%p110_p2) target bundleno = 648 (0x288), region = 28  ;;  %p127_p3 = scmp.lt.s32.totalorder (!%p110_p2), %s426_s11, 3 }
   0x7   : > { %s164_s17 = scalar_lea.vmem (!%p110_p2), [#allocation2], %s426_s11 }
   0xb   : > { %v397_v0 = vmov 6.0   ;;  %s128_s12 = scalar_select %p127_p3, %s426_s11, 3  ;;  %vm134_vm0 = vcmask 259072   ;;  %vm161_vm2 = vcmask 1041409   ;;  %vm165_vm3 = vcmask 254976  }
   0xc   : > { %361 = vrcp.f32 %v397_v0 }
   0xd   : > { %s327_s13 = sshll.u32 %s128_s12, 3 }
   0xe   : > { %s130_s16 = scalar_lea.vmem %s450_s0, %s327_s13 }
   0xf   : > { %v132_v2 = vld [vmem:[%s130_s16] sm:$0x3f]  ;;  %v133_v3 = vld [vmem:[%s130_s16 + $0x8] sm:$0x3f] }
  0x10   : > { %v135_v4 = vsel %vm134_vm0, %v132_v2, 0.0  ;;  %v142_v5 = vsel %vm134_vm0, %v133_v3, 0.0 }
  0x11   : > { %v136_v7 = vrot.slane %v135_v4, 4  ;;  %v143_v8 = vrot.slane %v142_v5, 4 }
  0x12   : > { %v362_v1 = vpop.eup %361 }
  0x13   : > { %v150_v6 = vmul.f32 6.0, %v362_v1  ;;  %v137_v10 = vadd.f32 %v136_v7, %v135_v4  ;;  %v144_v11 = vadd.f32 %v143_v8, %v142_v5  ;;  %vm154_vm1 = vweird.f32 %v362_v1 }
  0x15   : > { %v151_v9 = vsub.f32 1.0, %v150_v6  ;;  %v138_v13 = vrot.slane %v137_v10, 2  ;;  %v145_v14 = vrot.slane %v144_v11, 2 }
  0x17   : > { %v152_v12 = vmul.f32 %v362_v1, %v151_v9  ;;  %v139_v16 = vadd.f32 %v138_v13, %v137_v10  ;;  %v146_v17 = vadd.f32 %v145_v14, %v144_v11 }
  0x19   : > { %v153_v15 = vadd.f32 %v362_v1, %v152_v12  ;;  %v140_v18 = vrot.slane %v139_v16, 1  ;;  %v147_v19 = vrot.slane %v146_v17, 1 }
  0x1b   : > { %v155_v20 = vsel %vm154_vm1, %v362_v1, %v153_v15  ;;  %v141_v21 = vadd.f32 %v140_v18, %v139_v16  ;;  %v148_v22 = vadd.f32 %v147_v19, %v146_v17 }
  0x1c   : > { %170 = sbr.rel (%p329_p4) target bundleno = 642 (0x282), region = 32 }
  0x1d   : > { %v156_v23 = vmul.f32 %v155_v20, %v141_v21  ;;  %v157_v24 = vmul.f32 %v155_v20, %v148_v22 }
  0x1f   : > { %v162_v25 = vsel %vm161_vm2, %v157_v24, %v156_v23 }
  0x20   : > { %166 = vst.msk [vmem:[%s164_s17] sm:$0x3] %vm165_vm3, %v162_v25 }
  0x21   : > { %v171_v26 = vld [vmem:[%s451_s1] sm:$0xf]  ;;  %vm172_vm4 = vcmask 257024   ;;  %vm176_vm5 = vcmask 261120   ;;  %vm249_vm9 = vcmask 3072   ;;  %vm222_vm10 = vcmask 64512  }
  0x22   : > { %173 = vst.msk [vmem:[#allocation2 + $0x4] sm:$0xf] %vm172_vm4, %v171_v26  ;;  %vm238_vm11 = vcmask 7168   ;;  %v398_v59 = vmov 8.0  }
  0x29   : > { %v174_v27 = vld [vmem:[#allocation2] sm:$0xff] }
  0x2a   : > { %v175_v28 = vmul.f32 %v174_v27, %v174_v27 }
  0x2c   : > { %v177_v29 = vsel %vm176_vm5, %v175_v28, 0.0 }
  0x2d   : > { %178 = vadd.xlane.f32.xlu0 %v177_v29 }
  0xa0   : > { %v179_v30 = vpop.xlane.xlu0 %178 }
  0xa1   : > { %v180_v31 = vadd.f32 1e-24, %v179_v30 }
  0xa3   : > { %363 = vrsqrt.f32 %v180_v31  ;;  %vm187_vm7 = vweird.f32 %v180_v31 }
  0xa9   : > { %v364_v32 = vpop.eup %363 }
  0xaa   : > { %v182_v33 = vmul.f32 %v364_v32, %v180_v31  ;;  %vm188_vm6 = vweird.f32 %v364_v32 }
  0xab   : > { %vm189_vm8 = vmor %vm187_vm7, %vm188_vm6 }
  0xac   : > { %v183_v34 = vmul.f32 %v364_v32, %v182_v33 }
  0xae   : > { %v184_v35 = vmul.f32 0.5, %v183_v34 }
  0xb0   : > { %v185_v36 = vsub.f32 1.5, %v184_v35 }
  0xb2   : > { %v186_v37 = vmul.f32 %v364_v32, %v185_v36 }
  0xb4   : > { %v190_v38 = vsel %vm189_vm8, %v364_v32, %v186_v37 }
  0xb5   : > { %v191_v39 = vmul.f32 %v190_v38, %v174_v27 }
  0xb7   : > { %330 = vmatpush.xpose.msk.msra.mxu0 %vm176_vm5, %v191_v39  ;;  %v192_v40 = vmul.f32 2.0, %v191_v39  ;;  %v231_v41 = vrot.slane %v191_v39, 4 }
  0xb9   : > { %v233_v42 = vmul.f32 %v231_v41, %v191_v39 }
  0xba   : > { %331 = vmatmul.msk.f32.vlgmr.msra.gmra.mxu0 %vm176_vm5, %v192_v40 }
  0xbb   : > { %v234_v43 = vsel %vm172_vm4, %v233_v42, 0.0 }
  0xbc   : > { %235 = vadd.xlane.f32.xlu1 %v234_v43 }
 0x12f   : > { %v236_v44 = vpop.xlane.xlu1 %235 }
 0x130   : > { %v237_v45 = vmul.f32 2.0, %v236_v44 }
 0x132   : > { %v250_v46 = vsel %vm249_vm9, %v237_v45, 0.0 }
 0x133   : > { %251 = vadd.xlane.f32.xlu2 %v250_v46 }
 0x137   : > { %v216_v47 = vpop.f32.mrf.mxu0 }
 0x138   : > { %v332_v48 = vadd.f32 -2.0, %v216_v47 }
 0x13a   : > { %v220_v49 = vmul.f32 1.442695, %v332_v48 }
 0x13c   : > { %365 = vpow2.f32 %v220_v49 }
 0x142   : > { %v366_v50 = vpop.eup %365 }
 0x143   : > { %v223_v51 = vsel %vm222_vm10, %v366_v50, 0.0 }
 0x144   : > { %224 = vadd.xlane.f32.xlu0 %v223_v51 }
 0x1a6   : > { %v252_v60 = vpop.xlane.xlu2 %251 }
 0x1a7   : > { %v253_v61 = vrot.slane %v252_v60, 4 }
 0x1a9   : > { %v254_v63 = vadd.f32 %v253_v61, %v252_v60 }
 0x1ab   : > { %v255_v1 = vrot.slane %v254_v63, 2 }
 0x1ad   : > { %v256_v6 = vadd.f32 %v255_v1, %v254_v63 }
 0x1af   : > { %v257_v10 = vrot.slane %v256_v6, 1 }
 0x1b1   : > { %v258_v14 = vadd.f32 %v257_v10, %v256_v6 }
 0x1b7   : > { %v225_v52 = vpop.xlane.xlu0 %224 }
 0x1b8   : > { %v333_v53 = vadd.f32 -1.0, %v225_v52 }
 0x1ba   : > { %v227_v54 = vmax.f32 %v333_v53, 1e-30 }
 0x1bc   : > { %367 = vlog2.f32 %v227_v54 }
 0x1bd   : > { %369 = vrcp.f32 %v398_v59 }
 0x1c2   : > { %v368_v55 = vpop.eup %367 }
 0x1c3   : > { %v229_v56 = vmul.f32 0.6931472, %v368_v55  ;;  %v370_v62 = vpop.eup %369 }
 0x1c4   : > { %v263_v0 = vmul.f32 8.0, %v370_v62  ;;  %vm267_vm12 = vweird.f32 %v370_v62 }
 0x1c5   : > { %v230_v57 = vadd.f32 2.0, %v229_v56 }
 0x1c6   : > { %v264_v3 = vsub.f32 1.0, %v263_v0 }
 0x1c7   : > { %v239_v58 = vsel %vm238_vm11, %v230_v57, 0.0 }
 0x1c8   : > { %240 = vadd.xlane.f32.xlu1 %v239_v58  ;;  %v265_v7 = vmul.f32 %v370_v62, %v264_v3 }
 0x1ca   : > { %v266_v11 = vadd.f32 %v370_v62, %v265_v7 }
 0x1cc   : > { %v268_v15 = vsel %vm267_vm12, %v370_v62, %v266_v11 }
 0x23b   : > { %v241_v2 = vpop.xlane.xlu1 %240 }
 0x23c   : > { %v242_v4 = vrot.slane %v241_v2, 4 }
 0x23e   : > { %v243_v5 = vadd.f32 %v242_v4, %v241_v2 }
 0x240   : > { %v244_v8 = vrot.slane %v243_v5, 2 }
 0x242   : > { %v245_v9 = vadd.f32 %v244_v8, %v243_v5 }
 0x244   : > { %v246_v12 = vrot.slane %v245_v9, 1 }
 0x246   : > { %v247_v13 = vadd.f32 %v246_v12, %v245_v9 }
 0x248   : > { %338 = vpush %v247_v13 }
 0x249   : > { %340 = vpush %v258_v14 }
 0x24a   : > { %342 = vpush %v268_v15 }
 0x279   : > { %s339_s20 = spop %338 }
 0x27a   : > { %s341_s21 = spop %340 }
 0x27b   : > { %s260_s22 = smul.f32 2.0, %s341_s21  ;;  %s343_s23 = spop %342 }
 0x27d   : > { %s261_s24 = ssub.f32 %s339_s20, %s260_s22 }
 0x27f   : > { %s270_s25 = smul.f32 %s343_s23, %s261_s24 }
 0x281   : > { %272 = sst [smem:[#allocation3]] %s270_s25 }
 0x282 PF: > { %p348_p5 = scmp.eq.s32.totalorder %s421_s10, 1  ;;  %s279_s28 = sshll.u32 %s452_s2, 4  ;;  %s280_s28 = int_to_ptr.hbm [resolvable:$true] %s279_s28 }
 0x283   : > { %s399_s29 = smov [#allocation3]  }
 0x284   : > { %345 = dma.smem_to_hbm (%p348_p5), %s399_s29, 16, %s280_s28, [#allocation4]  }
 0x285   : > { %390 = dma.done.wait (%p348_p5), [#allocation4], 16  }
 0x286   : > { %392 = vsyncadd (%p348_p5), [#allocation4], 4294967280 }
 0x287   : > { %288 = sfence }
 0x288 PF: > { %s13_s9 = sadd.s32 1, %s395_s9  }
 0x289   : > { %p10_p6 = scmp.ge.s32.totalorder %s13_s9, 4  }
 0x28b   :  { %12 = sbr.rel (!%p10_p6) target bundleno = 1 (0x1), region = 61 }
 0x290   :  { %294 = vsyncpa [#allocation4], 1 }
 0x291   :  { %296 = vsyncpa [#allocation4 + $0x1], 1 }

</bundles_post_ra>
